<compile_context>
chip_gen: v6e
topology: v6e:2x2x1
jax: 0.10.0
libtpu: 0.0.40
codegen_flags: <defaults>
</compile_context>

<pallas_src>
import functools

import jax
import jax.numpy as jnp
from jax.experimental import pallas as pl
from jax.experimental.pallas import tpu as pltpu


def _mlp_kernel(x_ref, w1_ref, b1_ref, w2_ref, b2_ref,
                w3_ref, b3_ref, w4_ref, b4_ref, out_ref, *, data_dim):
    # ----- network_head (tiny: recomputed per tail, always VMEM-resident) -----
    x = x_ref[...]
    h = jnp.maximum(
        jnp.dot(x, w1_ref[...], preferred_element_type=jnp.float32) + b1_ref[...], 0.0)
    h = jnp.maximum(
        jnp.dot(h, w2_ref[...], preferred_element_type=jnp.float32) + b2_ref[...], 0.0)

    # ----- network_tail[t] (tail block selected by the BlockSpec index_map) -----
    h = jnp.maximum(
        jnp.dot(h, w3_ref[0], preferred_element_type=jnp.float32) + b3_ref[0], 0.0)
    tmp = jnp.dot(h, w4_ref[0], preferred_element_type=jnp.float32) + b4_ref[0]

    # Single lane-contiguous output: [mu | std]; std = exp(0.5 * logvar).
    lane = jax.lax.broadcasted_iota(jnp.int32, tmp.shape, dimension=1)
    out = jnp.where(lane < data_dim, tmp, jnp.exp(0.5 * tmp))
    out_ref[0] = out.astype(out_ref.dtype)


def _mlp_kernel_single(t_ref, *refs, data_dim):
    # Scalar-prefetch ref `t` is only consumed by the index_maps.
    del t_ref
    _mlp_kernel(*refs, data_dim=data_dim)


def _prep_params(params, data_dim):
    w1, b1, w2, b2, W3, B3, W4, B4 = params
    hidden = w1.shape[1]
    out_dim = 2 * data_dim
    N = W3.shape[0]
    # Rank-2 / rank-3 biases so every VMEM block's last two dims equal the
    # full array dims (satisfies the (8,128) block rule trivially).
    return (w1, b1.reshape(1, hidden), w2, b2.reshape(1, hidden),
            W3, B3.reshape(N, 1, hidden), W4, B4.reshape(N, 1, out_dim),
            hidden, out_dim, N)


def mlp_forward(x, params, t, *, data_dim):
    """Module-equivalent forward: (x, t) -> (mu, std) for a single (traced) tail t."""
    w1, b1, w2, b2, W3, B3, W4, B4, hidden, out_dim, N = _prep_params(params, data_dim)
    B = x.shape[0]

    t_arr = jnp.asarray(t, dtype=jnp.int32).reshape(1)

    grid_spec = pltpu.PrefetchScalarGridSpec(
        num_scalar_prefetch=1,
        grid=(1,),
        in_specs=[
            pl.BlockSpec((B, data_dim), lambda i, t_ref: (0, 0)),
            pl.BlockSpec((data_dim, hidden), lambda i, t_ref: (0, 0)),
            pl.BlockSpec((1, hidden), lambda i, t_ref: (0, 0)),
            pl.BlockSpec((hidden, hidden), lambda i, t_ref: (0, 0)),
            pl.BlockSpec((1, hidden), lambda i, t_ref: (0, 0)),
            pl.BlockSpec((1, hidden, hidden), lambda i, t_ref: (t_ref[0], 0, 0)),
            pl.BlockSpec((1, 1, hidden), lambda i, t_ref: (t_ref[0], 0, 0)),
            pl.BlockSpec((1, hidden, out_dim), lambda i, t_ref: (t_ref[0], 0, 0)),
            pl.BlockSpec((1, 1, out_dim), lambda i, t_ref: (t_ref[0], 0, 0)),
        ],
        out_specs=pl.BlockSpec((1, B, out_dim), lambda i, t_ref: (0, 0, 0)),
    )

    out = pl.pallas_call(
        functools.partial(_mlp_kernel_single, data_dim=data_dim),
        out_shape=jax.ShapeDtypeStruct((1, B, out_dim), x.dtype),
        grid_spec=grid_spec,
        compiler_params=pltpu.CompilerParams(
            dimension_semantics=("arbitrary",)),
    )(t_arr, x, w1, b1, w2, b2, W3, B3, W4, B4)

    mu = out[0, :, :data_dim]
    std = out[0, :, data_dim:]
    return mu, std


def mlp_forward_all_tails(x, params, *, data_dim):
    """All N tails fused into one gridded pallas_call: returns (mu, std) of shape (N, B, data_dim)."""
    w1, b1, w2, b2, W3, B3, W4, B4, hidden, out_dim, N = _prep_params(params, data_dim)
    B = x.shape[0]

    out = pl.pallas_call(
        functools.partial(_mlp_kernel, data_dim=data_dim),
        out_shape=jax.ShapeDtypeStruct((N, B, out_dim), x.dtype),
        grid=(N,),
        in_specs=[
            pl.BlockSpec((B, data_dim), lambda t: (0, 0)),
            pl.BlockSpec((data_dim, hidden), lambda t: (0, 0)),
            pl.BlockSpec((1, hidden), lambda t: (0, 0)),
            pl.BlockSpec((hidden, hidden), lambda t: (0, 0)),
            pl.BlockSpec((1, hidden), lambda t: (0, 0)),
            pl.BlockSpec((1, hidden, hidden), lambda t: (t, 0, 0)),
            pl.BlockSpec((1, 1, hidden), lambda t: (t, 0, 0)),
            pl.BlockSpec((1, hidden, out_dim), lambda t: (t, 0, 0)),
            pl.BlockSpec((1, 1, out_dim), lambda t: (t, 0, 0)),
        ],
        out_specs=pl.BlockSpec((1, B, out_dim), lambda t: (t, 0, 0)),
        compiler_params=pltpu.CompilerParams(
            dimension_semantics=("parallel",)),  # shards tails across v7x's 2 TCs
    )(x, w1, b1, w2, b2, W3, B3, W4, B4)

    mu = out[:, :, :data_dim]
    std = out[:, :, data_dim:]
    return mu, std


def init_params(key, N=40, data_dim=2, hidden_dim=64, dtype=jnp.float32):
    """Deterministic PyTorch-style (uniform +/- 1/sqrt(fan_in)) init.
    Weights are stored as [in_features, out_features]."""
    ks = jax.random.split(key, 8)

    def lin(kw, kb, fan_in, fan_out, batch=None):
        bound = 1.0 / jnp.sqrt(fan_in)
        shape_w = (fan_in, fan_out) if batch is None else (batch, fan_in, fan_out)
        shape_b = (fan_out,) if batch is None else (batch, fan_out)
        w = jax.random.uniform(kw, shape_w, dtype, -bound, bound)
        b = jax.random.uniform(kb, shape_b, dtype, -bound, bound)
        return w, b

    w1, b1 = lin(ks[0], ks[1], data_dim, hidden_dim)
    w2, b2 = lin(ks[2], ks[3], hidden_dim, hidden_dim)
    W3, B3 = lin(ks[4], ks[5], hidden_dim, hidden_dim, batch=N)
    W4, B4 = lin(ks[6], ks[7], hidden_dim, data_dim * 2, batch=N)
    return (w1, b1, w2, b2, W3, B3, W4, B4)


if __name__ == "__main__":
    N, data_dim, hidden_dim = 40, 2, 64
    batch = 8
    key = jax.random.PRNGKey(0)
    kx, kp = jax.random.split(key)

    x = jax.random.normal(kx, (batch, data_dim), jnp.float32)
    params = init_params(kp, N=N, data_dim=data_dim, hidden_dim=hidden_dim)

    fwd = jax.jit(functools.partial(mlp_forward, data_dim=data_dim))
    fwd_all = jax.jit(functools.partial(mlp_forward_all_tails, data_dim=data_dim))

    # Pure-JAX reference.
    w1, b1, w2, b2, W3, B3, W4, B4 = params
    h0 = jnp.maximum(x @ w1 + b1, 0.0)
    h0 = jnp.maximum(h0 @ w2 + b2, 0.0)

    def ref_tail(t):
        h = jnp.maximum(h0 @ W3[t] + B3[t], 0.0)
        tmp = h @ W4[t] + B4[t]
        return tmp[:, :data_dim], jnp.exp(0.5 * tmp[:, data_dim:])

    # Single-tail forward with traced t: one compile serves every tail index.
    for t in (3, 17):
        mu, std = fwd(x, params, jnp.int32(t))
        jax.block_until_ready((mu, std))
        mu_r, std_r = ref_tail(t)
        assert jnp.allclose(mu, mu_r, atol=1e-5), f"mu mismatch at t={t}"
        assert jnp.allclose(std, std_r, atol=1e-5), f"std mismatch at t={t}"

    # Fused all-tails forward (one gridded pallas_call over N tails).
    mu_all, std_all = fwd_all(x, params)
    jax.block_until_ready((mu_all, std_all))
    for t in (0, 17, N - 1):
        mu_r, std_r = ref_tail(t)
        assert jnp.allclose(mu_all[t], mu_r, atol=1e-5), f"mu(all) mismatch at t={t}"
        assert jnp.allclose(std_all[t], std_r, atol=1e-5), f"std(all) mismatch at t={t}"

    print("KERNEL_OK")
</pallas_src>

<mosaic_0001>
module attributes {stable_mosaic.version = 11 : i64} {
  func.func @_mlp_kernel_single(%arg0: i32, %arg1: memref<1xi32, #tpu.memory_space<smem>>, %arg2: memref<8x2xf32, #tpu.memory_space<vmem>>, %arg3: memref<2x64xf32, #tpu.memory_space<vmem>>, %arg4: memref<1x64xf32, #tpu.memory_space<vmem>>, %arg5: memref<64x64xf32, #tpu.memory_space<vmem>>, %arg6: memref<1x64xf32, #tpu.memory_space<vmem>>, %arg7: memref<1x64x64xf32, #tpu.memory_space<vmem>>, %arg8: memref<1x1x64xf32, #tpu.memory_space<vmem>>, %arg9: memref<1x64x4xf32, #tpu.memory_space<vmem>>, %arg10: memref<1x1x4xf32, #tpu.memory_space<vmem>>, %arg11: memref<1x8x4xf32, #tpu.memory_space<vmem>>) attributes {dimension_semantics = [#tpu.dimension_semantics<arbitrary>], iteration_bounds = array<i64: 1>, scalar_prefetch = 1 : i64, scratch_operands = 0 : i64, tpu.core_type = #tpu.core_type<tc>, window_params = [{pipeline_mode = #tpu.pipeline_mode<synchronous>, transform_indices = @transform_0, window_bounds = array<i64: 8, 2>}, {pipeline_mode = #tpu.pipeline_mode<synchronous>, transform_indices = @transform_1, window_bounds = array<i64: 2, 64>}, {pipeline_mode = #tpu.pipeline_mode<synchronous>, transform_indices = @transform_2, window_bounds = array<i64: 1, 64>}, {pipeline_mode = #tpu.pipeline_mode<synchronous>, transform_indices = @transform_3, window_bounds = array<i64: 64, 64>}, {pipeline_mode = #tpu.pipeline_mode<synchronous>, transform_indices = @transform_4, window_bounds = array<i64: 1, 64>}, {transform_indices = @transform_5, window_bounds = array<i64: 1, 64, 64>}, {transform_indices = @transform_6, window_bounds = array<i64: 1, 1, 64>}, {transform_indices = @transform_7, window_bounds = array<i64: 1, 64, 4>}, {transform_indices = @transform_8, window_bounds = array<i64: 1, 1, 4>}, {pipeline_mode = #tpu.pipeline_mode<synchronous>, transform_indices = @transform_9, window_bounds = array<i64: 1, 8, 4>}]} {
    %c0 = arith.constant 0 : index
    %c0_0 = arith.constant 0 : index
    %0 = vector.load %arg2[%c0, %c0_0] : memref<8x2xf32, #tpu.memory_space<vmem>>, vector<8x2xf32>
    %c0_1 = arith.constant 0 : index
    %c0_2 = arith.constant 0 : index
    %1 = vector.load %arg3[%c0_1, %c0_2] : memref<2x64xf32, #tpu.memory_space<vmem>>, vector<2x64xf32>
    %cst = arith.constant dense<0.000000e+00> : vector<8x64xf32>
    %2 = tpu.matmul %0, %1, %cst {dimension_numbers = #tpu.dot_dimension_numbers<[1], [0], [0], [1], [0, 0, 1, 1], [], []>} : vector<8x2xf32>, vector<2x64xf32>, vector<8x64xf32> -> vector<8x64xf32>
    %c0_3 = arith.constant 0 : index
    %c0_4 = arith.constant 0 : index
    %3 = vector.load %arg4[%c0_3, %c0_4] : memref<1x64xf32, #tpu.memory_space<vmem>>, vector<1x64xf32>
    %4 = vector.broadcast %3 : vector<1x64xf32> to vector<8x64xf32>
    %5 = arith.addf %2, %4 : vector<8x64xf32>
    %cst_5 = arith.constant 0.000000e+00 : f32
    %6 = vector.broadcast %cst_5 : f32 to vector<8x64xf32>
    %7 = arith.maximumf %5, %6 : vector<8x64xf32>
    %c0_6 = arith.constant 0 : index
    %c0_7 = arith.constant 0 : index
    %8 = vector.load %arg5[%c0_6, %c0_7] : memref<64x64xf32, #tpu.memory_space<vmem>>, vector<64x64xf32>
    %cst_8 = arith.constant dense<0.000000e+00> : vector<8x64xf32>
    %9 = tpu.matmul %7, %8, %cst_8 {dimension_numbers = #tpu.dot_dimension_numbers<[1], [0], [0], [1], [0, 0, 1, 1], [], []>} : vector<8x64xf32>, vector<64x64xf32>, vector<8x64xf32> -> vector<8x64xf32>
    %c0_9 = arith.constant 0 : index
    %c0_10 = arith.constant 0 : index
    %10 = vector.load %arg6[%c0_9, %c0_10] : memref<1x64xf32, #tpu.memory_space<vmem>>, vector<1x64xf32>
    %11 = vector.broadcast %10 : vector<1x64xf32> to vector<8x64xf32>
    %12 = arith.addf %9, %11 : vector<8x64xf32>
    %cst_11 = arith.constant 0.000000e+00 : f32
    %13 = vector.broadcast %cst_11 : f32 to vector<8x64xf32>
    %14 = arith.maximumf %12, %13 : vector<8x64xf32>
    %c0_12 = arith.constant 0 : index
    %c0_13 = arith.constant 0 : index
    %c0_14 = arith.constant 0 : index
    %15 = vector.load %arg7[%c0_12, %c0_13, %c0_14] : memref<1x64x64xf32, #tpu.memory_space<vmem>>, vector<1x64x64xf32>
    %16 = vector.shape_cast %15 : vector<1x64x64xf32> to vector<64x64xf32>
    %cst_15 = arith.constant dense<0.000000e+00> : vector<8x64xf32>
    %17 = tpu.matmul %14, %16, %cst_15 {dimension_numbers = #tpu.dot_dimension_numbers<[1], [0], [0], [1], [0, 0, 1, 1], [], []>} : vector<8x64xf32>, vector<64x64xf32>, vector<8x64xf32> -> vector<8x64xf32>
    %c0_16 = arith.constant 0 : index
    %c0_17 = arith.constant 0 : index
    %c0_18 = arith.constant 0 : index
    %18 = vector.load %arg8[%c0_16, %c0_17, %c0_18] : memref<1x1x64xf32, #tpu.memory_space<vmem>>, vector<1x1x64xf32>
    %19 = vector.shape_cast %18 : vector<1x1x64xf32> to vector<1x64xf32>
    %20 = vector.broadcast %19 : vector<1x64xf32> to vector<8x64xf32>
    %21 = arith.addf %17, %20 : vector<8x64xf32>
    %cst_19 = arith.constant 0.000000e+00 : f32
    %22 = vector.broadcast %cst_19 : f32 to vector<8x64xf32>
    %23 = arith.maximumf %21, %22 : vector<8x64xf32>
    %c0_20 = arith.constant 0 : index
    %c0_21 = arith.constant 0 : index
    %c0_22 = arith.constant 0 : index
    %24 = vector.load %arg9[%c0_20, %c0_21, %c0_22] : memref<1x64x4xf32, #tpu.memory_space<vmem>>, vector<1x64x4xf32>
    %25 = vector.shape_cast %24 : vector<1x64x4xf32> to vector<64x4xf32>
    %cst_23 = arith.constant dense<0.000000e+00> : vector<8x4xf32>
    %26 = tpu.matmul %23, %25, %cst_23 {dimension_numbers = #tpu.dot_dimension_numbers<[1], [0], [0], [1], [0, 0, 1, 1], [], []>} : vector<8x64xf32>, vector<64x4xf32>, vector<8x4xf32> -> vector<8x4xf32>
    %c0_24 = arith.constant 0 : index
    %c0_25 = arith.constant 0 : index
    %c0_26 = arith.constant 0 : index
    %27 = vector.load %arg10[%c0_24, %c0_25, %c0_26] : memref<1x1x4xf32, #tpu.memory_space<vmem>>, vector<1x1x4xf32>
    %28 = vector.shape_cast %27 : vector<1x1x4xf32> to vector<1x4xf32>
    %29 = vector.broadcast %28 : vector<1x4xf32> to vector<8x4xf32>
    %30 = arith.addf %26, %29 : vector<8x4xf32>
    %31 = tpu.iota {dimensions = array<i32: 1>} : vector<8x4xi32>
    %c2_i32 = arith.constant 2 : i32
    %32 = vector.broadcast %c2_i32 : i32 to vector<8x4xi32>
    %33 = arith.cmpi slt, %31, %32 : vector<8x4xi32>
    %cst_27 = arith.constant 5.000000e-01 : f32
    %34 = vector.broadcast %cst_27 : f32 to vector<8x4xf32>
    %35 = arith.mulf %34, %30 : vector<8x4xf32>
    %36 = math.exp %35 : vector<8x4xf32>
    %37 = arith.select %33, %30, %36 : vector<8x4xi1>, vector<8x4xf32>
    %c0_28 = arith.constant 0 : index
    %c0_29 = arith.constant 0 : index
    %c0_30 = arith.constant 0 : index
    %38 = vector.load %arg11[%c0_28, %c0_29, %c0_30] : memref<1x8x4xf32, #tpu.memory_space<vmem>>, vector<1x8x4xf32>
    %39 = vector.shape_cast %38 : vector<1x8x4xf32> to vector<8x4xf32>
    %40 = vector.shape_cast %37 : vector<8x4xf32> to vector<1x8x4xf32>
    tpu.vector_store %arg11[%c0_28, %c0_29, %c0_30], %40 {strides = array<i32>} : memref<1x8x4xf32, #tpu.memory_space<vmem>>, vector<1x8x4xf32>,
    return
  }
  func.func @transform_0(%arg0: i32, %arg1: memref<1xi32, #tpu.memory_space<smem>>) -> (i32, i32) {
    %c0_i32 = arith.constant 0 : i32
    %c0_i32_0 = arith.constant 0 : i32
    %c0_i32_1 = arith.constant 0 : i32
    return %c0_i32, %c0_i32_0 : i32, i32
  }
  func.func @transform_1(%arg0: i32, %arg1: memref<1xi32, #tpu.memory_space<smem>>) -> (i32, i32) {
    %c0_i32 = arith.constant 0 : i32
    %c0_i32_0 = arith.constant 0 : i32
    %c0_i32_1 = arith.constant 0 : i32
    return %c0_i32, %c0_i32_0 : i32, i32
  }
  func.func @transform_2(%arg0: i32, %arg1: memref<1xi32, #tpu.memory_space<smem>>) -> (i32, i32) {
    %c0_i32 = arith.constant 0 : i32
    %c0_i32_0 = arith.constant 0 : i32
    %c0_i32_1 = arith.constant 0 : i32
    return %c0_i32, %c0_i32_0 : i32, i32
  }
  func.func @transform_3(%arg0: i32, %arg1: memref<1xi32, #tpu.memory_space<smem>>) -> (i32, i32) {
    %c0_i32 = arith.constant 0 : i32
    %c0_i32_0 = arith.constant 0 : i32
    %c0_i32_1 = arith.constant 0 : i32
    return %c0_i32, %c0_i32_0 : i32, i32
  }
  func.func @transform_4(%arg0: i32, %arg1: memref<1xi32, #tpu.memory_space<smem>>) -> (i32, i32) {
    %c0_i32 = arith.constant 0 : i32
    %c0_i32_0 = arith.constant 0 : i32
    %c0_i32_1 = arith.constant 0 : i32
    return %c0_i32, %c0_i32_0 : i32, i32
  }
  func.func @transform_5(%arg0: i32, %arg1: memref<1xi32, #tpu.memory_space<smem>>) -> (i32, i32, i32) {
    %c0 = arith.constant 0 : index
    %0 = memref.load %arg1[%c0] : memref<1xi32, #tpu.memory_space<smem>>
    %c0_i32 = arith.constant 0 : i32
    %c0_i32_0 = arith.constant 0 : i32
    %c0_i32_1 = arith.constant 0 : i32
    return %0, %c0_i32, %c0_i32_0 : i32, i32, i32
  }
  func.func @transform_6(%arg0: i32, %arg1: memref<1xi32, #tpu.memory_space<smem>>) -> (i32, i32, i32) {
    %c0 = arith.constant 0 : index
    %0 = memref.load %arg1[%c0] : memref<1xi32, #tpu.memory_space<smem>>
    %c0_i32 = arith.constant 0 : i32
    %c0_i32_0 = arith.constant 0 : i32
    %c0_i32_1 = arith.constant 0 : i32
    return %0, %c0_i32, %c0_i32_0 : i32, i32, i32
  }
  func.func @transform_7(%arg0: i32, %arg1: memref<1xi32, #tpu.memory_space<smem>>) -> (i32, i32, i32) {
    %c0 = arith.constant 0 : index
    %0 = memref.load %arg1[%c0] : memref<1xi32, #tpu.memory_space<smem>>
    %c0_i32 = arith.constant 0 : i32
    %c0_i32_0 = arith.constant 0 : i32
    %c0_i32_1 = arith.constant 0 : i32
    return %0, %c0_i32, %c0_i32_0 : i32, i32, i32
  }
  func.func @transform_8(%arg0: i32, %arg1: memref<1xi32, #tpu.memory_space<smem>>) -> (i32, i32, i32) {
    %c0 = arith.constant 0 : index
    %0 = memref.load %arg1[%c0] : memref<1xi32, #tpu.memory_space<smem>>
    %c0_i32 = arith.constant 0 : i32
    %c0_i32_0 = arith.constant 0 : i32
    %c0_i32_1 = arith.constant 0 : i32
    return %0, %c0_i32, %c0_i32_0 : i32, i32, i32
  }
  func.func @transform_9(%arg0: i32, %arg1: memref<1xi32, #tpu.memory_space<smem>>) -> (i32, i32, i32) {
    %c0_i32 = arith.constant 0 : i32
    %c0_i32_0 = arith.constant 0 : i32
    %c0_i32_1 = arith.constant 0 : i32
    %c0_i32_2 = arith.constant 0 : i32
    return %c0_i32, %c0_i32_0, %c0_i32_1 : i32, i32, i32
  }
}

</mosaic_0001>

<bundles_post_ra>
// kernel: mlp_forward.1
= control target key start
LH: loop header
LB: loop body
LE: loop exit
PB: predicated region body
PF: predicated region fallthrough
CT: control target
= control target key end

     0   :  { %vm115_vm0 = vcmask 1041408   ;;  %vm111_vm1 = vcmask 15360   ;;  %v598_v0 = vmov 0.0   ;;  %vm599_vm2 = vmmov 0   ;;  %s767_s2 = inlined_call_operand.vmem [shape: f32[2,64], index: 2, kind: input, shape index: {}]   ;;  %s768_s1 = inlined_call_operand.vmem [shape: f32[8,2], index: 1, kind: input, shape index: {}]   ;;  %s769_s4 = inlined_call_operand.vmem [shape: f32[64,64], index: 4, kind: input, shape index: {}]   ;;  %s770_s0 = inlined_call_operand.<no memory space> [shape: s32[1], index: 0, kind: input, shape index: {}]   ;;  %s771_s6 = inlined_call_operand.vmem [shape: f32[40,64,64], index: 6, kind: input, shape index: {}]   ;;  %s772_s3 = inlined_call_operand.vmem [shape: f32[1,64], index: 3, kind: input, shape index: {}]   ;;  %s773_s8 = inlined_call_operand.vmem [shape: f32[40,64,4], index: 8, kind: input, shape index: {}]   ;;  %s774_s5 = inlined_call_operand.vmem [shape: f32[1,64], index: 5, kind: input, shape index: {}]   ;;  %s775_s7 = inlined_call_operand.vmem [shape: f32[40,1,64], index: 7, kind: input, shape index: {}]   ;;  %s776_s9 = inlined_call_operand.vmem [shape: f32[40,1,4], index: 9, kind: input, shape index: {}]   ;;  %s777_s10 = inlined_call_operand.vmem [shape: f32[1,8,4], index: 10, kind: output, shape index: {}]  }
   0x1   :  { %532 = vmatprep.subr.mxu0 %v598_v0  ;;  %v103_v1 = vld [vmem:[%s767_s2] sm:$0x3]  ;;  %534 = vmatprep.mubr.msk.f32.mxu0 %vm599_vm2, %v598_v0  ;;  %v197_v3 = vld [vmem:[%s769_s4 + $0x38] sm:$0xff]  ;;  %v196_v4 = vld [vmem:[%s769_s4 + $0x30] sm:$0xff]  ;;  %p79_p0 = scmp.lt.s32.totalorder %s770_s0, 39  ;;  %vm205_vm3 = vcmask 523264   ;;  %v457_v48 = vlaneseq }
   0x2   :  { %v102_v2 = vld [vmem:[%s768_s1] sm:$0xff]  ;;  %533 = vmatpush3.msk.msra.mxu0 %vm115_vm0, %v103_v1  ;;  %537 = vmatprep.subr.mxu1 %v598_v0  ;;  %v195_v5 = vld [vmem:[%s769_s4 + $0x28] sm:$0xff]  ;;  %v193_v7 = vld [vmem:[%s769_s4 + $0x18] sm:$0xff]  ;;  %vm464_vm5 = vcmask 31744  }
   0x3   :  { %535 = vmatmul.mubr.msk.f32.vlgmr.msra.gmra.mxu0 %vm111_vm1, %v102_v2  ;;  %538 = vmatpush3.msra.mxu1 %v197_v3  ;;  %v194_v6 = vld [vmem:[%s769_s4 + $0x20] sm:$0xff]  ;;  %v192_v8 = vld [vmem:[%s769_s4 + $0x10] sm:$0xff]  ;;  %v191_v9 = vld [vmem:[%s769_s4 + $0x8] sm:$0xff]  ;;  %s779_s0 = smov (!%p79_p0, %s770_s0), 39  ;;  %v458_v49 = vand.u32 127, %v457_v48 }
   0x4   :  { %539 = vmatprep.subr.mxu1 %v598_v0  ;;  %553 = vmatprep.mubr.msk.f32.mxu1 %vm599_vm2, %v598_v0  ;;  %v190_v10 = vld [vmem:[%s769_s4] sm:$0xff]  ;;  %s501_s15 = sshll.u32 %s779_s0, 6  ;;  %s100_s24 = scalar_lea.vmem %s776_s9, %s779_s0 }
   0x5   :  { %540 = vmatpush3.msra.mxu1 %v196_v4  ;;  %556 = vmatprep.subr.mxu0 %v598_v0  ;;  %s716_s4 = scalar_lea.vmem %s771_s6, %s501_s15  ;;  %v492_v16 = vld [vmem:[%s772_s3] ss:$0 sm:$0xff]  ;;  %s95_s20 = scalar_lea.vmem %s773_s8, %s501_s15  ;;  %vm459_vm4 = vcmp.lt.s32.totalorder %v458_v49, 2 }
   0x6   :  { %541 = vmatprep.subr.mxu1 %v598_v0  ;;  %572 = vmatprep.mubr.msk.f32.mxu0 %vm599_vm2, %v598_v0  ;;  %v287_v11 = vld [vmem:[%s716_s4 + $0x38] sm:$0xff]  ;;  %v286_v12 = vld [vmem:[%s716_s4 + $0x30] sm:$0xff]  ;;  %v285_v13 = vld [vmem:[%s716_s4 + $0x28] sm:$0xff] }
   0x7   :  { %542 = vmatpush3.msra.mxu1 %v195_v5  ;;  %557 = vmatpush3.msra.mxu0 %v287_v11  ;;  %v284_v14 = vld [vmem:[%s716_s4 + $0x20] sm:$0xff]  ;;  %v283_v15 = vld [vmem:[%s716_s4 + $0x18] sm:$0xff]  ;;  %v282_v21 = vld [vmem:[%s716_s4 + $0x10] sm:$0xff] }
   0x8   :  { %543 = vmatprep.subr.mxu1 %v598_v0  ;;  %558 = vmatprep.subr.mxu0 %v598_v0  ;;  %v281_v22 = vld [vmem:[%s716_s4 + $0x8] sm:$0xff]  ;;  %v280_v23 = vld [vmem:[%s716_s4] sm:$0xff]  ;;  %v376_v24 = vld [vmem:[%s95_s20 + $0x38] sm:$0xff] }
   0x9   :  { %544 = vmatpush3.msra.mxu1 %v194_v6  ;;  %559 = vmatpush3.msra.mxu0 %v286_v12  ;;  %v375_v25 = vld [vmem:[%s95_s20 + $0x30] sm:$0xff]  ;;  %v374_v26 = vld [vmem:[%s95_s20 + $0x28] sm:$0xff]  ;;  %v373_v27 = vld [vmem:[%s95_s20 + $0x20] sm:$0xff] }
   0xa   :  { %545 = vmatprep.subr.mxu1 %v598_v0  ;;  %560 = vmatprep.subr.mxu0 %v598_v0  ;;  %v372_v28 = vld [vmem:[%s95_s20 + $0x18] sm:$0xff]  ;;  %v495_v29 = vld [vmem:[%s774_s5] ss:$0 sm:$0xff]  ;;  %v371_v34 = vld [vmem:[%s95_s20 + $0x10] sm:$0xff]  ;;  %s88_s5 = scalar_lea.vmem %s775_s7, %s779_s0 }
   0xb   :  { %546 = vmatpush3.msra.mxu1 %v193_v7  ;;  %561 = vmatpush3.msra.mxu0 %v285_v13  ;;  %v370_v35 = vld [vmem:[%s95_s20 + $0x8] sm:$0xff]  ;;  %v369_v36 = vld [vmem:[%s95_s20] sm:$0xff] }
   0xc   :  { %547 = vmatprep.subr.mxu1 %v598_v0  ;;  %562 = vmatprep.subr.mxu0 %v598_v0  ;;  %v497_v37 = vld [vmem:[%s88_s5] ss:$0 sm:$0xff] }
   0xd   :  { %548 = vmatpush3.msra.mxu1 %v192_v8  ;;  %563 = vmatpush3.msra.mxu0 %v284_v14  ;;  %v499_v42 = vld [vmem:[%s100_s24] ss:$0 sm:$0xff] }
   0xe   :  { %549 = vmatprep.subr.mxu1 %v598_v0  ;;  %564 = vmatprep.subr.mxu0 %v598_v0 }
   0xf   :  { %550 = vmatpush3.msra.mxu1 %v191_v9  ;;  %565 = vmatpush3.msra.mxu0 %v283_v15 }
  0x10   :  { %551 = vmatprep.subr.mxu1 %v598_v0  ;;  %566 = vmatprep.subr.mxu0 %v598_v0 }
  0x11   :  { %552 = vmatpush3.msra.mxu1 %v190_v10  ;;  %567 = vmatpush3.msra.mxu0 %v282_v21 }
  0x12   :  { %575 = vmatprep.subr.mxu1 %v598_v0  ;;  %568 = vmatprep.subr.mxu0 %v598_v0 }
  0x13   :  { %569 = vmatpush3.msra.mxu0 %v281_v22 }
  0x14   :  { %570 = vmatprep.subr.mxu0 %v598_v0 }
  0x15   :  { %571 = vmatpush3.msra.mxu0 %v280_v23 }
  0xc3   :  { %v185_v17 = vpop.f32.mrf.mxu0 }
  0xc4   :  { %v186_v18 = vadd.f32 %v492_v16, %v185_v17 }
  0xc5   :  { %v536_v19 = vpop.f32.mrf.mxu0 }
  0xc6   :  { %v189_v20 = vmax.f32 %v186_v18, 0.0 }
  0xc8   :  { %554 = vmatmul.mubr.msk.f32.vlgmr.msra.gmra.mxu1 %vm205_vm3, %v189_v20 }
  0xc9   :  { %591 = vmatprep.mubr.msk.f32.mxu1 %vm599_vm2, %v598_v0  ;;  %576 = vmatpush3.msra.mxu1 %v376_v24 }
  0xca   :  { %577 = vmatprep.subr.mxu1 %v598_v0 }
  0xcb   :  { %578 = vmatpush3.msra.mxu1 %v375_v25 }
  0xcc   :  { %579 = vmatprep.subr.mxu1 %v598_v0 }
  0xcd   :  { %580 = vmatpush3.msra.mxu1 %v374_v26 }
  0xce   :  { %581 = vmatprep.subr.mxu1 %v598_v0 }
  0xcf   :  { %582 = vmatpush3.msra.mxu1 %v373_v27 }
  0xd0   :  { %583 = vmatprep.subr.mxu1 %v598_v0 }
  0xd1   :  { %584 = vmatpush3.msra.mxu1 %v372_v28 }
  0xd2   :  { %585 = vmatprep.subr.mxu1 %v598_v0 }
  0xd3   :  { %586 = vmatpush3.msra.mxu1 %v371_v34 }
  0xd4   :  { %587 = vmatprep.subr.mxu1 %v598_v0 }
  0xd5   :  { %588 = vmatpush3.msra.mxu1 %v370_v35 }
  0xd6   :  { %589 = vmatprep.subr.mxu1 %v598_v0 }
  0xd7   :  { %590 = vmatpush3.msra.mxu1 %v369_v36 }
 0x188   :  { %v275_v30 = vpop.f32.mrf.mxu1 }
 0x189   :  { %v276_v31 = vadd.f32 %v495_v29, %v275_v30 }
 0x18a   :  { %v555_v32 = vpop.f32.mrf.mxu1 }
 0x18b   :  { %v279_v33 = vmax.f32 %v276_v31, 0.0 }
 0x18d   :  { %573 = vmatmul.mubr.msk.f32.vlgmr.msra.gmra.mxu0 %vm205_vm3, %v279_v33 }
 0x24d   :  { %v364_v38 = vpop.f32.mrf.mxu0 }
 0x24e   :  { %v365_v39 = vadd.f32 %v497_v37, %v364_v38 }
 0x24f   :  { %v574_v40 = vpop.f32.mrf.mxu0 }
 0x250   :  { %v368_v41 = vmax.f32 %v365_v39, 0.0 }
 0x252   :  { %592 = vmatmul.mubr.msk.f32.vlgmr.msra.gmra.mxu1 %vm205_vm3, %v368_v41 }
 0x312   :  { %v453_v43 = vpop.f32.mrf.mxu1 }
 0x313   :  { %v454_v44 = vadd.f32 %v499_v42, %v453_v43 }
 0x314   :  { %v593_v45 = vpop.f32.mrf.mxu1 }
 0x315   :  { %v460_v46 = vmul.f32 0.5, %v454_v44 }
 0x317   :  { %v461_v47 = vmul.f32 1.442695, %v460_v46 }
 0x319   :  { %596 = vpow2.f32 %v461_v47 }
 0x326   :  { %v597_v50 = vpop.eup %596 }
 0x327   :  { %v463_v51 = vsel %vm459_vm4, %v454_v44, %v597_v50 }
 0x328   :  { %465 = vst.msk [vmem:[%s777_s10] sm:$0xff] %vm464_vm5, %v463_v51 }

</bundles_post_ra>
